<compile_context>
chip_gen: v7x
topology: tpu7x:2x2x1
jax: 0.10.0
libtpu: 0.0.40
codegen_flags: <defaults>
</compile_context>

<pallas_src>
import jax
import jax.numpy as jnp
import numpy as np
from jax.experimental import pallas as pl
from jax.experimental.pallas import tpu as pltpu

_SQRT2 = 1.4142135623730951
_F32 = jnp.dtype(jnp.float32)


def _gelu_exact(x):
    # torch.nn.GELU() default: 0.5 * x * (1 + erf(x / sqrt(2)))
    return 0.5 * x * (1.0 + jax.lax.erf(x / _SQRT2))


def _cdiv(a: int, b: int) -> int:
    return -(-a // b)


def _round_up(x: int, m: int) -> int:
    return _cdiv(x, m) * m


def _default_max_tile_n() -> int:
    # Generation-aware batch-tile cap (perf review): v7x has 2 TensorCores and
    # 3.2 TB/s HBM so bigger tiles amortise the ~0.35us/step grid overhead;
    # v5e has only 1 vector-store slot per bundle, so keep tiles small enough
    # that the [E*h, tile_n] f32 intermediates do not spill.
    try:
        kind = jax.devices()[0].device_kind.lower()
    except Exception:
        return 512
    if "v7" in kind:
        return 2048
    if "v6" in kind:
        return 1024
    return 512


def _pick_tile_and_pad(n: int, max_tile_n: int):
    """Lane-aligned (multiple-of-128) batch tile and padded batch size.

    Guarantees tile_n | n_pad, tile_n <= max_tile_n, and >=2 grid steps
    whenever there is more than one 128-row tile of work (so both v7x
    TensorCores get work under dimension_semantics=('parallel',))."""
    max_tile_n = max(128, _round_up(max_tile_n, 128))
    n128 = _round_up(max(n, 1), 128)
    num_steps = max(2, _cdiv(n128, max_tile_n)) if n128 > 128 else 1
    tile_n = _round_up(_cdiv(n128, num_steps), 128)
    n_pad = tile_n * _cdiv(n128, tile_n)
    return tile_n, n_pad


def _make_ensemble_kernel(num_members, h1, num_mid, d_out, act, compute_dtype):
    """Kernel: stacked first hidden layer for all members, per-member rest."""

    def kernel(x_ref, w1_ref, *refs):
        mid_refs = refs[:num_mid]        # each: [E, out_l, in_l]
        wf_ref = refs[num_mid]           # [E, h_last, d_out] (transposed final W)
        out_ref = refs[num_mid + 1]      # [E*d_out, tile_n]

        x = x_ref[...]                   # [tile_n, d_in], natural layout
        if compute_dtype != _F32:
            x = x.astype(compute_dtype)

        # First hidden layer of EVERY ensemble member in one MXU matmul:
        #   W1_all @ x^T : [E*h1, d_in] x [d_in, tile_n] -> [E*h1, tile_n]
        h_all = act(jax.lax.dot_general(
            w1_ref[...], x,
            dimension_numbers=(((1,), (1,)), ((), ())),
            preferred_element_type=jnp.float32))

        outs = []
        for e in range(num_members):
            h = h_all[e * h1:(e + 1) * h1, :]            # [h1, tile_n] f32
            for l in range(num_mid):
                w = mid_refs[l][e]                        # [out_l, in_l]
                rhs = h if compute_dtype == _F32 else h.astype(compute_dtype)
                h = act(jnp.dot(w, rhs, preferred_element_type=jnp.float32))
            wf_t = wf_ref[e]                              # [h_last, d_out]
            if d_out == 1:
                # 1-output-row "matmul": VPU broadcast-multiply + sublane
                # (XLU) reduce instead of a nearly empty MXU push/pop.
                o = jnp.sum(wf_t.astype(jnp.float32) * h,
                            axis=0, keepdims=True)        # [1, tile_n]
            else:
                rhs = h if compute_dtype == _F32 else h.astype(compute_dtype)
                o = jax.lax.dot_general(
                    wf_t, rhs,
                    dimension_numbers=(((0,), (0,)), ((), ())),
                    preferred_element_type=jnp.float32)    # [d_out, tile_n]
            outs.append(o)

        res = outs[0] if num_members == 1 else jnp.concatenate(outs, axis=0)
        out_ref[...] = res.astype(out_ref.dtype)           # lane-dense store

    return kernel


def atomic_ensemble_forward(features, member_weights, *, tile_n=None,
                            max_tile_n=None, approximate_gelu=False,
                            compute_dtype=None):
    """Forward of an AtomicContainer ensemble for the atoms of one species.

    features:        [N, d_in] AEVs.
    member_weights:  length-E list; member_weights[e] is the list of
                     torch-layout Linear weights [out_i, in_i] of member e
                     (all members share one architecture, bias=False).
    approximate_gelu / compute_dtype: optional numerics-tradeoff levers
                     (tanh GELU on the EUP, bf16 matmul inputs). Default off
                     to match torch exactly.
    returns:         [E, N, d_out] per-member atomic outputs (float32).
    """
    features = jnp.asarray(features, jnp.float32)
    assert features.ndim == 2
    N, d_in = features.shape

    E = len(member_weights)
    assert E >= 1
    shapes0 = [tuple(np.shape(w)) for w in member_weights[0]]
    assert len(shapes0) >= 2, "need at least one hidden layer + final linear"
    for m in member_weights:
        assert [tuple(np.shape(w)) for w in m] == shapes0, \
            "all ensemble members must share an architecture"
    assert shapes0[0][1] == d_in
    num_hidden = len(shapes0) - 1
    num_mid = num_hidden - 1
    h1 = shapes0[0][0]
    d_out = shapes0[-1][0]

    compute_dtype = _F32 if compute_dtype is None else jnp.dtype(compute_dtype)
    act = (lambda v: jax.nn.gelu(v, approximate=True)) if approximate_gelu \
        else _gelu_exact

    def _w(a):
        a = jnp.asarray(a, jnp.float32)
        return a if compute_dtype == _F32 else a.astype(compute_dtype)

    # Stacked weights (KBs; wrapper-side concatenation is negligible next to
    # the [N, d_in] feature traffic, which is now read exactly once).
    w1_stk = jnp.concatenate([_w(m[0]) for m in member_weights], axis=0)
    mid_stks = [jnp.stack([_w(m[1 + l]) for m in member_weights], axis=0)
                for l in range(num_mid)]
    wf_t_stk = jnp.stack([_w(m[-1]).T for m in member_weights], axis=0)

    # Batch tiling: lane-aligned tile + padded N. Padding rows are zeros and
    # are sliced off the output, so they never touch real atoms.
    if max_tile_n is None:
        max_tile_n = _default_max_tile_n()
    if tile_n is None:
        tile_n, n_pad = _pick_tile_and_pad(N, max_tile_n)
    else:
        assert tile_n % 128 == 0, "tile_n must be a multiple of 128"
        n_pad = _round_up(max(N, 1), tile_n)
    x = features if n_pad == N else jnp.pad(features, ((0, n_pad - N), (0, 0)))

    kernel = _make_ensemble_kernel(E, h1, num_mid, d_out, act, compute_dtype)

    x_spec = pl.BlockSpec((tile_n, d_in), lambda i: (i, 0))
    # Grid-invariant weights: unblocked whole-array VMEM operands -> copied
    # into VMEM once, no per-step DMA and no double-buffering.
    w_specs = [pl.BlockSpec(memory_space=pltpu.MemorySpace.VMEM)
               for _ in range(1 + num_mid + 1)]
    out_spec = pl.BlockSpec((E * d_out, tile_n), lambda i: (0, i))

    out_t = pl.pallas_call(
        kernel,
        out_shape=jax.ShapeDtypeStruct((E * d_out, n_pad), jnp.float32),
        grid_spec=pltpu.PrefetchScalarGridSpec(
            num_scalar_prefetch=0,
            grid=(n_pad // tile_n,),
            in_specs=[x_spec] + w_specs,
            out_specs=out_spec,
        ),
        compiler_params=pltpu.CompilerParams(
            dimension_semantics=("parallel",)),
    )(x, w1_stk, *mid_stks, wf_t_stk)

    out_t = out_t[:, :N]                                   # drop padded atoms
    return jnp.transpose(out_t.reshape(E, d_out, N), (0, 2, 1))


def atomic_network_forward(features, weights, **kwargs):
    """Single AtomicNetwork forward: features [N, d_in] -> [N, d_out]."""
    return atomic_ensemble_forward(features, [weights], **kwargs)[0]


def _ensemble_ref(features, member_weights):
    """Pure-JAX reference of the torch forward (correctness check)."""
    outs = []
    for weights in member_weights:
        h = jnp.asarray(features, jnp.float32)
        for w in weights[:-1]:
            h = _gelu_exact(h @ jnp.asarray(w, jnp.float32).T)
        outs.append(h @ jnp.asarray(weights[-1], jnp.float32).T)
    return jnp.stack(outs, axis=0)


if __name__ == "__main__":
    # AtomicNetwork(layer_dims=(32, 64, 48, 1), activation='gelu', bias=False);
    # two ensemble members sharing the same AEV input (AtomicContainer).
    layer_dims = (32, 64, 48, 1)
    E = 2
    N = 200   # deliberately NOT a multiple of 128: exercises the padding path

    key = jax.random.PRNGKey(0)
    members = []
    for _ in range(E):
        ws = []
        for din, dout in zip(layer_dims[:-1], layer_dims[1:]):
            key, sub = jax.random.split(key)
            bound = 1.0 / np.sqrt(din)
            ws.append(jax.random.uniform(sub, (dout, din), jnp.float32,
                                         minval=-bound, maxval=bound))
        members.append(ws)
    key, sub = jax.random.split(key)
    features = jax.random.normal(sub, (N, layer_dims[0]), jnp.float32)

    out = jax.block_until_ready(atomic_ensemble_forward(features, members))
    ref = jax.block_until_ready(_ensemble_ref(features, members))
    assert out.shape == (E, N, layer_dims[-1])
    np.testing.assert_allclose(np.asarray(out), np.asarray(ref),
                               rtol=1e-5, atol=1e-5)

    # Single-member path (plain AtomicNetwork).
    out1 = jax.block_until_ready(atomic_network_forward(features, members[0]))
    np.testing.assert_allclose(np.asarray(out1), np.asarray(ref[0]),
                               rtol=1e-5, atol=1e-5)

    # TODO(synk): AtomicContainer's ensemble bookkeeping (set_active_members,
    # get_active_members_num, symbols, atomic_numbers buffer) and the
    # base-class zero-returning forward are host-side Python, not kernel work.
    print("KERNEL_OK")
</pallas_src>

<mosaic_0001>
module attributes {stable_mosaic.version = 11 : i64} {
  func.func @kernel(%arg0: i32, %arg1: memref<128x32xf32, #tpu.memory_space<vmem>>, %arg2: memref<128x32xf32, #tpu.memory_space<vmem>>, %arg3: memref<2x48x64xf32, #tpu.memory_space<vmem>>, %arg4: memref<2x48x1xf32, #tpu.memory_space<vmem>>, %arg5: memref<2x128xf32, #tpu.memory_space<vmem>>) attributes {dimension_semantics = [#tpu.dimension_semantics<parallel>], iteration_bounds = array<i64: 2>, scalar_prefetch = 0 : i64, scratch_operands = 0 : i64, tpu.core_type = #tpu.core_type<tc>, window_params = [{transform_indices = @transform_0, window_bounds = array<i64: 128, 32>}, {pipeline_mode = #tpu.pipeline_mode<synchronous>, transform_indices = @transform_1, window_bounds = array<i64: 128, 32>}, {pipeline_mode = #tpu.pipeline_mode<synchronous>, transform_indices = @transform_2, window_bounds = array<i64: 2, 48, 64>}, {pipeline_mode = #tpu.pipeline_mode<synchronous>, transform_indices = @transform_3, window_bounds = array<i64: 2, 48, 1>}, {transform_indices = @transform_4, window_bounds = array<i64: 2, 128>}]} {
    %c0 = arith.constant 0 : index
    %c0_0 = arith.constant 0 : index
    %0 = vector.load %arg1[%c0, %c0_0] : memref<128x32xf32, #tpu.memory_space<vmem>>, vector<128x32xf32>
    %c0_1 = arith.constant 0 : index
    %c0_2 = arith.constant 0 : index
    %1 = vector.load %arg2[%c0_1, %c0_2] : memref<128x32xf32, #tpu.memory_space<vmem>>, vector<128x32xf32>
    %cst = arith.constant dense<0.000000e+00> : vector<128x128xf32>
    %2 = tpu.matmul %1, %0, %cst {dimension_numbers = #tpu.dot_dimension_numbers<[1], [1], [0], [0], [0, 0, 1, 0], [], []>} : vector<128x32xf32>, vector<128x32xf32>, vector<128x128xf32> -> vector<128x128xf32>
    %cst_3 = arith.constant 5.000000e-01 : f32
    %3 = vector.broadcast %cst_3 : f32 to vector<128x128xf32>
    %4 = arith.mulf %3, %2 : vector<128x128xf32>
    %cst_4 = arith.constant 1.41421354 : f32
    %5 = vector.broadcast %cst_4 : f32 to vector<128x128xf32>
    %6 = arith.divf %2, %5 : vector<128x128xf32>
    %7 = math.erf %6 : vector<128x128xf32>
    %cst_5 = arith.constant 1.000000e+00 : f32
    %8 = vector.broadcast %cst_5 : f32 to vector<128x128xf32>
    %9 = arith.addf %8, %7 : vector<128x128xf32>
    %10 = arith.mulf %4, %9 : vector<128x128xf32>
    %11 = vector.extract_strided_slice %10 {offsets = [0, 0], sizes = [64, 128], strides = [1, 1]} : vector<128x128xf32> to vector<64x128xf32>
    %c0_6 = arith.constant 0 : index
    %c0_7 = arith.constant 0 : index
    %c0_8 = arith.constant 0 : index
    %12 = vector.load %arg3[%c0_6, %c0_7, %c0_8] : memref<2x48x64xf32, #tpu.memory_space<vmem>>, vector<1x48x64xf32>
    %13 = vector.shape_cast %12 : vector<1x48x64xf32> to vector<48x64xf32>
    %cst_9 = arith.constant dense<0.000000e+00> : vector<48x128xf32>
    %14 = tpu.matmul %13, %11, %cst_9 {dimension_numbers = #tpu.dot_dimension_numbers<[1], [0], [0], [1], [0, 0, 1, 1], [], []>} : vector<48x64xf32>, vector<64x128xf32>, vector<48x128xf32> -> vector<48x128xf32>
    %cst_10 = arith.constant 5.000000e-01 : f32
    %15 = vector.broadcast %cst_10 : f32 to vector<48x128xf32>
    %16 = arith.mulf %15, %14 : vector<48x128xf32>
    %cst_11 = arith.constant 1.41421354 : f32
    %17 = vector.broadcast %cst_11 : f32 to vector<48x128xf32>
    %18 = arith.divf %14, %17 : vector<48x128xf32>
    %19 = math.erf %18 : vector<48x128xf32>
    %cst_12 = arith.constant 1.000000e+00 : f32
    %20 = vector.broadcast %cst_12 : f32 to vector<48x128xf32>
    %21 = arith.addf %20, %19 : vector<48x128xf32>
    %22 = arith.mulf %16, %21 : vector<48x128xf32>
    %c0_13 = arith.constant 0 : index
    %c0_14 = arith.constant 0 : index
    %c0_15 = arith.constant 0 : index
    %23 = vector.load %arg4[%c0_13, %c0_14, %c0_15] : memref<2x48x1xf32, #tpu.memory_space<vmem>>, vector<1x48x1xf32>
    %24 = vector.shape_cast %23 : vector<1x48x1xf32> to vector<48x1xf32>
    %25 = vector.broadcast %24 : vector<48x1xf32> to vector<48x128xf32>
    %26 = arith.mulf %25, %22 : vector<48x128xf32>
    %cst_16 = arith.constant dense<0.000000e+00> : vector<128xf32>
    %27 = vector.multi_reduction <add>, %26, %cst_16 [0] : vector<48x128xf32> to vector<128xf32>
    %28 = vector.shape_cast %27 : vector<128xf32> to vector<1x128xf32>
    %29 = vector.extract_strided_slice %10 {offsets = [64, 0], sizes = [64, 128], strides = [1, 1]} : vector<128x128xf32> to vector<64x128xf32>
    %c1 = arith.constant 1 : index
    %c0_17 = arith.constant 0 : index
    %c0_18 = arith.constant 0 : index
    %30 = vector.load %arg3[%c1, %c0_17, %c0_18] : memref<2x48x64xf32, #tpu.memory_space<vmem>>, vector<1x48x64xf32>
    %31 = vector.shape_cast %30 : vector<1x48x64xf32> to vector<48x64xf32>
    %cst_19 = arith.constant dense<0.000000e+00> : vector<48x128xf32>
    %32 = tpu.matmul %31, %29, %cst_19 {dimension_numbers = #tpu.dot_dimension_numbers<[1], [0], [0], [1], [0, 0, 1, 1], [], []>} : vector<48x64xf32>, vector<64x128xf32>, vector<48x128xf32> -> vector<48x128xf32>
    %cst_20 = arith.constant 5.000000e-01 : f32
    %33 = vector.broadcast %cst_20 : f32 to vector<48x128xf32>
    %34 = arith.mulf %33, %32 : vector<48x128xf32>
    %cst_21 = arith.constant 1.41421354 : f32
    %35 = vector.broadcast %cst_21 : f32 to vector<48x128xf32>
    %36 = arith.divf %32, %35 : vector<48x128xf32>
    %37 = math.erf %36 : vector<48x128xf32>
    %cst_22 = arith.constant 1.000000e+00 : f32
    %38 = vector.broadcast %cst_22 : f32 to vector<48x128xf32>
    %39 = arith.addf %38, %37 : vector<48x128xf32>
    %40 = arith.mulf %34, %39 : vector<48x128xf32>
    %c1_23 = arith.constant 1 : index
    %c0_24 = arith.constant 0 : index
    %c0_25 = arith.constant 0 : index
    %41 = vector.load %arg4[%c1_23, %c0_24, %c0_25] : memref<2x48x1xf32, #tpu.memory_space<vmem>>, vector<1x48x1xf32>
    %42 = vector.shape_cast %41 : vector<1x48x1xf32> to vector<48x1xf32>
    %43 = vector.broadcast %42 : vector<48x1xf32> to vector<48x128xf32>
    %44 = arith.mulf %43, %40 : vector<48x128xf32>
    %cst_26 = arith.constant dense<0.000000e+00> : vector<128xf32>
    %45 = vector.multi_reduction <add>, %44, %cst_26 [0] : vector<48x128xf32> to vector<128xf32>
    %46 = vector.shape_cast %45 : vector<128xf32> to vector<1x128xf32>
    %47 = tpu.concatenate %28, %46 in 0 : vector<1x128xf32>, vector<1x128xf32> -> vector<2x128xf32>
    %c0_27 = arith.constant 0 : index
    %c0_28 = arith.constant 0 : index
    %48 = vector.load %arg5[%c0_27, %c0_28] : memref<2x128xf32, #tpu.memory_space<vmem>>, vector<2x128xf32>
    tpu.vector_store %arg5[%c0_27, %c0_28], %47 {strides = array<i32>} : memref<2x128xf32, #tpu.memory_space<vmem>>, vector<2x128xf32>,
    return
  }
  func.func @transform_0(%arg0: i32) -> (i32, i32) {
    %c0_i32 = arith.constant 0 : i32
    %c0_i32_0 = arith.constant 0 : i32
    return %arg0, %c0_i32 : i32, i32
  }
  func.func @transform_1(%arg0: i32) -> (i32, i32) {
    %c0_i32 = arith.constant 0 : i32
    %c0_i32_0 = arith.constant 0 : i32
    %c0_i32_1 = arith.constant 0 : i32
    return %c0_i32, %c0_i32_0 : i32, i32
  }
  func.func @transform_2(%arg0: i32) -> (i32, i32, i32) {
    %c0_i32 = arith.constant 0 : i32
    %c0_i32_0 = arith.constant 0 : i32
    %c0_i32_1 = arith.constant 0 : i32
    %c0_i32_2 = arith.constant 0 : i32
    return %c0_i32, %c0_i32_0, %c0_i32_1 : i32, i32, i32
  }
  func.func @transform_3(%arg0: i32) -> (i32, i32, i32) {
    %c0_i32 = arith.constant 0 : i32
    %c0_i32_0 = arith.constant 0 : i32
    %c0_i32_1 = arith.constant 0 : i32
    %c0_i32_2 = arith.constant 0 : i32
    return %c0_i32, %c0_i32_0, %c0_i32_1 : i32, i32, i32
  }
  func.func @transform_4(%arg0: i32) -> (i32, i32) {
    %c0_i32 = arith.constant 0 : i32
    %c0_i32_0 = arith.constant 0 : i32
    return %c0_i32, %arg0 : i32, i32
  }
}

</mosaic_0001>

<bundles_post_ra>
// kernel: tpu_custom_call.1
= control target key start
LH: loop header
LB: loop body
LE: loop exit
PB: predicated region body
PF: predicated region fallthrough
CT: control target
= control target key end

     0   :  { %9 = vsyncpa [#allocation3], 0  ;;  %s1844_s0 = inlined_call_operand.vmem [shape: f32[256,32], index: 0, kind: input, shape index: {}]   ;;  %s1845_s1 = inlined_call_operand.vmem [shape: f32[128,32], index: 1, kind: input, shape index: {}]   ;;  %s1846_s2 = inlined_call_operand.vmem [shape: f32[2,48,64], index: 2, kind: input, shape index: {}]   ;;  %s1847_s3 = inlined_call_operand.vmem [shape: f32[2,48,1], index: 3, kind: input, shape index: {}]   ;;  %s1848_s4 = inlined_call_operand.hbm [shape: f32[2,256], index: 4, kind: output, shape index: {}]  }
   0x1   :  { %11 = vsyncpa [#allocation3 + $0x1], 0  ;;  %s1538_s15 = smov 0   ;;  %s1540_s16 = smov 0  }
   0x2   :  { %s1542_s17 = smov 0   ;;  %s1544_s18 = smov 0  }
   0x3 LB: > { %s1559_s19 = sadd.s32 4294967295, %s1509_s18   ;;  %s1036_s20 = sadd.s32 4294967294, %s1509_s18   ;;  %s1509_s18 = sphi %s1544_s18, %s1856_s18   ;;  %s1505_s17 = sphi %s1542_s17, %s1855_s17   ;;  %s1501_s16 = sphi %s1540_s16, %s1854_s16   ;;  %s1497_s15 = sphi %s1538_s15, %s1853_s15  }
   0x4   : > { %s1563_s21 = sadd.s32 1, %s1509_s18   ;;  %s113_s22 = sadd.s32 1, %s1505_s17 }
   0x5   : > { %s110_s23 = ssub.s32 %s1509_s18, %s1563_s21  ;;  %p123_p0 = scmp.ne.s32.totalorder %s1505_s17, %s1501_s16 }
   0x6   : > { %p111_p1 = scmp.eq.s32.totalorder %s110_s23, 0  ;;  %p124_p2 = scmp.eq.s32.totalorder %s1559_s19, 1 }
   0x7   : > { %p129_p3 = scmp.ne.s32.totalorder %s1501_s16, %s1497_s15  ;;  %p130_p4 = scmp.eq.s32.totalorder %s1036_s20, 1 }
   0x8   : > { %s1574_s24 = scalar_select %p111_p1, %s1505_s17, %s113_s22  }
   0x9   : > { %p1576_p5 = por %p124_p2, %p123_p0  ;;  %p1580_p6 = por %p130_p4, %p129_p3 }
   0xa   : > { %p1039_p7 = scmp.ge.s32.totalorder %s1509_s18, 1  ;;  %p166_p8 = scmp.lt.s32.totalorder %s1509_s18, 3 }
   0xc   : > { %p167_p9 = pnand %p1039_p7, %p166_p8 }
   0xd   : > { %s1041_s27 = sshll.u32 (!%p167_p9), %s1559_s19, 4  ;;  %vm230_vm0 = vcmask (!%p167_p9), 261120   ;;  %v214_v0 = vld [vmem:[%s1845_s1] sm:$0xff] (!%p167_p9)  ;;  %v215_v26 = vld [vmem:[%s1845_s1 + $0x8] sm:$0xff] (!%p167_p9)  ;;  %v216_v27 = vld [vmem:[%s1845_s1 + $0x10] sm:$0xff] (!%p167_p9)  ;;  %vm559_vm2 = vcmask (!%p167_p9), 523264  }
   0xe   : > { %170 = sbr.rel (%p167_p9) target bundleno = 626 (0x272), region = 36  ;;  %p193_p10 = scmp.lt.s32.totalorder (!%p167_p9), %s1041_s27, 31  ;;  %1195 = vmatprep.mubr.msk.f32.mxu0 (!%p167_p9), %vm230_vm0, %v214_v0  ;;  %vm1598_vm1 = vmpackc.low (!%p167_p9), %vm230_vm0, %vm230_vm0  ;;  %v217_v28 = vld [vmem:[%s1845_s1 + $0x18] sm:$0xff] (!%p167_p9)  ;;  %v218_v29 = vld [vmem:[%s1845_s1 + $0x20] sm:$0xff] (!%p167_p9)  ;;  %v1511_v44 = vmov (!%p167_p9), 0   ;;  %vm960_vm3 = vcmask (!%p167_p9), 1040384  }
   0xf   : > { %v219_v30 = vld [vmem:[%s1845_s1 + $0x28] sm:$0xff] (!%p167_p9)  ;;  %v220_v31 = vld [vmem:[%s1845_s1 + $0x30] sm:$0xff] (!%p167_p9)  ;;  %v221_v32 = vld [vmem:[%s1845_s1 + $0x38] sm:$0xff] (!%p167_p9)  ;;  %1390 = vset.pattern.permute.xlu1 (!%p167_p9), %v1511_v44  ;;  %1389 = vset.pattern.permute.xlu0 (!%p167_p9), %v1511_v44  ;;  %s1100_s29 = sshll.u32 (!%p167_p9), %s1559_s19, 5  ;;  %s1512_s19 = smov (!%p167_p9), [#allocation2]  }
  0x10   : > { %v222_v33 = vld [vmem:[%s1845_s1 + $0x40] sm:$0xff] (!%p167_p9)  ;;  %v223_v34 = vld [vmem:[%s1845_s1 + $0x48] sm:$0xff] (!%p167_p9)  ;;  %v224_v35 = vld [vmem:[%s1845_s1 + $0x50] sm:$0xff] (!%p167_p9)  ;;  %s1802_s8 = scalar_lea.hbm (!%p167_p9), %s1848_s4, %s1100_s29  ;;  %s1451_s11 = sshll.u32 (!%p167_p9), %s1512_s19, 4  ;;  %s1452_s11 = int_to_ptr.vmem [resolvable:$false] %s1451_s11 }
  0x11   : > { %v225_v36 = vld [vmem:[%s1845_s1 + $0x58] sm:$0xff] (!%p167_p9)  ;;  %v226_v37 = vld [vmem:[%s1845_s1 + $0x60] sm:$0xff] (!%p167_p9)  ;;  %v227_v38 = vld [vmem:[%s1845_s1 + $0x68] sm:$0xff] (!%p167_p9)  ;;  %s1453_s12 = scalar_lea.vmem (!%p167_p9), %s1452_s11, 64 }
  0x12   : > { %v228_v39 = vld [vmem:[%s1845_s1 + $0x70] sm:$0xff] (!%p167_p9)  ;;  %v229_v40 = vld [vmem:[%s1845_s1 + $0x78] sm:$0xff] (!%p167_p9)  ;;  %v553_v41 = vld [vmem:[%s1846_s2] sm:$0xff] (!%p167_p9) }
  0x13   : > { %1235 = vmatprep.mubr.msk.f32.mxu1 (!%p167_p9), %vm559_vm2, %v553_v41  ;;  %v1093_v42 = vld [vmem:[%s1847_s3 + $0x30] sm:$0xff] (!%p167_p9)  ;;  %v703_v43 = vld [vmem:[%s1847_s3] sm:$0xff] (!%p167_p9)  ;;  %v1094_v45 = vld [vmem:[%s1847_s3 + $0x38] sm:$0xff] (!%p167_p9) }
  0x14   : > { %915 = vperm.xlu1 (!%p167_p9), %1390, %v1093_v42   ;;  %711 = vperm.xlu0 (!%p167_p9), %1389, %v703_v43   ;;  %v704_v46 = vld [vmem:[%s1847_s3 + $0x8] sm:$0xff] (!%p167_p9)  ;;  %v1095_v47 = vld [vmem:[%s1847_s3 + $0x40] sm:$0xff] (!%p167_p9)  ;;  %v705_v48 = vld [vmem:[%s1847_s3 + $0x10] sm:$0xff] (!%p167_p9) }
  0x15   : > { %s1858_s27 = smov (!%p193_p10, %s1041_s27), 31  ;;  %v1096_v49 = vld [vmem:[%s1847_s3 + $0x48] sm:$0xff]  ;;  %v706_v50 = vld [vmem:[%s1847_s3 + $0x18] sm:$0xff]  ;;  %v1097_v51 = vld [vmem:[%s1847_s3 + $0x50] sm:$0xff] }
  0x16   : > { %s1042_s30 = sshll.u32 %s1858_s27, 3  ;;  %v707_v52 = vld [vmem:[%s1847_s3 + $0x20] sm:$0xff]  ;;  %v1098_v53 = vld [vmem:[%s1847_s3 + $0x58] sm:$0xff]  ;;  %v708_v54 = vld [vmem:[%s1847_s3 + $0x28] sm:$0xff]  ;;  %s189_s27 = sand.u32 1, %s1501_s16  }
  0x17   : > { %s1594_s7 = scalar_lea.vmem %s1844_s0, %s1042_s30  ;;  %s1040_s28 = sshll.u32 %s189_s27, 1 }
  0x18   : > { %v198_v2 = vld [vmem:[%s1594_s7] sm:$0xff]  ;;  %v199_v3 = vld [vmem:[%s1594_s7 + $0x8] sm:$0xff]  ;;  %v200_v4 = vld [vmem:[%s1594_s7 + $0x10] sm:$0xff]  ;;  %920 = vperm.xlu1 %1390, %v1094_v45   ;;  %716 = vperm.xlu0 %1389, %v704_v46   ;;  %s191_s30 = scalar_lea.vmem [#allocation2], %s1040_s28  ;;  %s964_s9 = scalar_lea.sflag [#allocation3], %s189_s27 }
  0x19   : > { %v1269_v5 = vpack.c.bf16 %v199_v3, %v198_v2  ;;  %v201_v6 = vld [vmem:[%s1594_s7 + $0x18] sm:$0xff]  ;;  %v202_v8 = vld [vmem:[%s1594_s7 + $0x20] sm:$0xff]  ;;  %v203_v9 = vld [vmem:[%s1594_s7 + $0x28] sm:$0xff]  ;;  %s977_s5 = sshll.u32 %s191_s30, 4  ;;  %s1804_s5 = int_to_ptr.vmem [resolvable:$true] %s977_s5 }
  0x1a   : > { %v1275_v7 = vpack.c.bf16 %v201_v6, %v200_v4  ;;  %v1281_v10 = vpack.c.bf16 %v203_v9, %v202_v8  ;;  %v204_v11 = vld [vmem:[%s1594_s7 + $0x30] sm:$0xff]  ;;  %v205_v12 = vld [vmem:[%s1594_s7 + $0x38] sm:$0xff]  ;;  %v206_v14 = vld [vmem:[%s1594_s7 + $0x40] sm:$0xff]  ;;  %s1447_s10 = scalar_lea.vmem %s1804_s5, 32  ;;  %p1454_p0 = scmp.lt.s32.totalorder %s1804_s5, %s1452_s11 }
  0x1b   : > { %1271 = vmatprep.subr.msk.bf16.mxu0 %vm1598_vm1, %v1269_v5  ;;  %v1287_v13 = vpack.c.bf16 %v205_v12, %v204_v11  ;;  %v207_v15 = vld [vmem:[%s1594_s7 + $0x48] sm:$0xff]  ;;  %v208_v17 = vld [vmem:[%s1594_s7 + $0x50] sm:$0xff]  ;;  %v209_v18 = vld [vmem:[%s1594_s7 + $0x58] sm:$0xff]  ;;  %p1448_p11 = scmp.ne.s32.totalorder %s1804_s5, %s1447_s10  ;;  %p1455_p1 = scmp.lt.s32.totalorder %s1453_s12, %s1447_s10 }
  0x1c   : > { %1274 = vmatpush3.bf16.xpose.msk.msra.mxu0 %vm1598_vm1, %v1269_v5  ;;  %v1293_v16 = vpack.c.bf16 %v207_v15, %v206_v14  ;;  %v1299_v19 = vpack.c.bf16 %v209_v18, %v208_v17  ;;  %v210_v20 = vld [vmem:[%s1594_s7 + $0x60] sm:$0xff]  ;;  %v211_v21 = vld [vmem:[%s1594_s7 + $0x68] sm:$0xff]  ;;  %v212_v23 = vld [vmem:[%s1594_s7 + $0x70] sm:$0xff]  ;;  %925 = vperm.xlu1 %1390, %v1095_v47  }
  0x1d   : > { %1277 = vmatprep.subr.msk.bf16.mxu0 %vm1598_vm1, %v1275_v7  ;;  %v1305_v22 = vpack.c.bf16 %v211_v21, %v210_v20  ;;  %v213_v24 = vld [vmem:[%s1594_s7 + $0x78] sm:$0xff]  ;;  %721 = vperm.xlu0 %1389, %v705_v48   ;;  %p1449_p12 = pnand %p1448_p11, %p1576_p5  ;;  %p1456_p2 = por %p1455_p1, %p1454_p0 }
  0x1e   : > { %v1311_v25 = vpack.c.bf16 %v213_v24, %v212_v23 }
  0x1f   : > { %p1450_p13 = pneg %p1449_p12 }
  0x20   : > { %930 = vperm.xlu1 %1390, %v1096_v49  }
  0x21   : > { %726 = vperm.xlu0 %1389, %v706_v50   ;;  %p1457_p3 = pnand %p1456_p2, %p1450_p13 }
  0x24   : > { %1280 = vmatpush3.bf16.xpose.msk.msra.mxu0 %vm1598_vm1, %v1275_v7  ;;  %935 = vperm.xlu1 %1390, %v1097_v51  }
  0x25   : > { %1283 = vmatprep.subr.msk.bf16.mxu0 %vm1598_vm1, %v1281_v10  ;;  %731 = vperm.xlu0 %1389, %v707_v52  }
  0x28   : > { %940 = vperm.xlu1 %1390, %v1098_v53  }
  0x29   : > { %736 = vperm.xlu0 %1389, %v708_v54  }
  0x2c   : > { %1286 = vmatpush3.bf16.xpose.msk.msra.mxu0 %vm1598_vm1, %v1281_v10 }
  0x2d   : > { %1289 = vmatprep.subr.msk.bf16.mxu0 %vm1598_vm1, %v1287_v13 }
  0x34   : > { %1292 = vmatpush3.bf16.xpose.msk.msra.mxu0 %vm1598_vm1, %v1287_v13 }
  0x35   : > { %1295 = vmatprep.subr.msk.bf16.mxu0 %vm1598_vm1, %v1293_v16 }
  0x3c   : > { %1298 = vmatpush3.bf16.xpose.msk.msra.mxu0 %vm1598_vm1, %v1293_v16 }
  0x3d   : > { %1301 = vmatprep.subr.msk.bf16.mxu0 %vm1598_vm1, %v1299_v19 }
  0x44   : > { %1304 = vmatpush3.bf16.xpose.msk.msra.mxu0 %vm1598_vm1, %v1299_v19 }
  0x45   : > { %1307 = vmatprep.subr.msk.bf16.mxu0 %vm1598_vm1, %v1305_v22 }
  0x4c   : > { %1310 = vmatpush3.bf16.xpose.msk.msra.mxu0 %vm1598_vm1, %v1305_v22 }
  0x4d   : > { %1313 = vmatprep.subr.msk.bf16.mxu0 %vm1598_vm1, %v1311_v25 }
  0x54   : > { %1316 = vmatpush3.bf16.xpose.msk.msra.mxu0 %vm1598_vm1, %v1311_v25 }
  0x5b   : > { %1196 = vmatmul.mubr.msk.f32.vlgmr.msra.gmra.mrb[0].mxu0 %vm230_vm0, %v215_v26 }
  0x5c   : > { %1198 = vmatprep.mubr.msk.f32.mxu0 %vm230_vm0, %v216_v27 }
  0x5f   : > { %1199 = vmatmul.mubr.msk.f32.gmra.mrb[2].mxu0 %vm230_vm0, %v217_v28 }
  0x60   : > { %1201 = vmatprep.mubr.msk.f32.mxu0 %vm230_vm0, %v218_v29 }
  0x63   : > { %1202 = vmatmul.mubr.msk.f32.gmra.mrb[4].mxu0 %vm230_vm0, %v219_v30 }
  0x64   : > { %1204 = vmatprep.mubr.msk.f32.mxu0 %vm230_vm0, %v220_v31 }
  0x67   : > { %1205 = vmatmul.mubr.msk.f32.gmra.mrb[6].mxu0 %vm230_vm0, %v221_v32 }
  0x68   : > { %1207 = vmatprep.mubr.msk.f32.mxu0 %vm230_vm0, %v222_v33 }
  0x6b   : > { %1208 = vmatmul.mubr.msk.f32.gmra.mrb[8].mxu0 %vm230_vm0, %v223_v34 }
  0x6c   : > { %1210 = vmatprep.mubr.msk.f32.mxu0 %vm230_vm0, %v224_v35 }
  0x6f   : > { %1211 = vmatmul.mubr.msk.f32.gmra.mrb[10].mxu0 %vm230_vm0, %v225_v36 }
  0x70   : > { %1213 = vmatprep.mubr.msk.f32.mxu0 %vm230_vm0, %v226_v37 }
  0x73   : > { %1214 = vmatmul.mubr.msk.f32.gmra.mrb[12].mxu0 %vm230_vm0, %v227_v38 }
  0x74   : > { %1216 = vmatprep.mubr.msk.f32.mxu0 %vm230_vm0, %v228_v39 }
  0x77   : > { %1217 = vmatmul.mubr.msk.f32.gmra.mrb[14].mxu0 %vm230_vm0, %v229_v40 }
 0x12e   : > { %v1197_v55 = vpop.f32.mrb[0].mxu0 }
 0x12f   : > { %v490_v56 = vmul.f32 0.70710677, %v1197_v55  ;;  %v393_v57 = vpop.f32.mrb[1].mxu0  ;;  %v473_v8 = vmul.f32 0.5, %v1197_v55 }
 0x130   : > { %v489_v58 = vmul.f32 0.70710677, %v393_v57  ;;  %v472_v11 = vmul.f32 0.5, %v393_v57 }
 0x131   : > { %1391 = verf.f32 %v490_v56 }
 0x132   : > { %1393 = verf.f32 %v489_v58  ;;  %v1200_v59 = vpop.f32.mrb[2].mxu0 }
 0x133   : > { %v492_v60 = vmul.f32 0.70710677, %v1200_v59  ;;  %v403_v61 = vpop.f32.mrb[3].mxu0  ;;  %v475_v20 = vmul.f32 0.5, %v1200_v59 }
 0x134   : > { %v491_v62 = vmul.f32 0.70710677, %v403_v61  ;;  %v474_v23 = vmul.f32 0.5, %v403_v61 }
 0x135   : > { %1395 = verf.f32 %v492_v60 }
 0x136   : > { %1397 = verf.f32 %v491_v62  ;;  %v1203_v63 = vpop.f32.mrb[4].mxu0 }
 0x137   : > { %v494_v0 = vmul.f32 0.70710677, %v1203_v63  ;;  %v413_v1 = vpop.f32.mrb[5].mxu0  ;;  %v477_v33 = vmul.f32 0.5, %v1203_v63 }
 0x138   : > { %v493_v2 = vmul.f32 0.70710677, %v413_v1  ;;  %v476_v36 = vmul.f32 0.5, %v413_v1 }
 0x139   : > { %1399 = verf.f32 %v494_v0 }
 0x13a   : > { %1401 = verf.f32 %v493_v2  ;;  %v1206_v3 = vpop.f32.mrb[6].mxu0 }
 0x13b   : > { %v1392_v4 = vpop.eup %1391  ;;  %v496_v5 = vmul.f32 0.70710677, %v1206_v3  ;;  %v423_v6 = vpop.f32.mrb[7].mxu0  ;;  %v479_v46 = vmul.f32 0.5, %v1206_v3 }
 0x13c   : > { %v1394_v7 = vpop.eup %1393  ;;  %v522_v9 = vadd.f32 1.0, %v1392_v4  ;;  %v495_v10 = vmul.f32 0.70710677, %v423_v6  ;;  %v478_v49 = vmul.f32 0.5, %v423_v6 }
 0x13d   : > { %v521_v12 = vadd.f32 1.0, %v1394_v7  ;;  %1403 = verf.f32 %v496_v5  ;;  %v554_v7 = vld [vmem:[%s1846_s2 + $0x8] sm:$0xff] }
 0x13e   : > { %1405 = verf.f32 %v495_v10  ;;  %v1209_v13 = vpop.f32.mrb[8].mxu0  ;;  %v538_v14 = vmul.f32 %v522_v9, %v473_v8 }
 0x13f   : > { %v1396_v15 = vpop.eup %1395  ;;  %v498_v16 = vmul.f32 0.70710677, %v1209_v13  ;;  %v433_v17 = vpop.f32.mrb[9].mxu0  ;;  %v537_v18 = vmul.f32 %v521_v12, %v472_v11  ;;  %v481_v59 = vmul.f32 0.5, %v1209_v13  ;;  %v555_v11 = vld [vmem:[%s1846_s2 + $0x10] sm:$0xff] }
 0x140   : > { %v1398_v19 = vpop.eup %1397  ;;  %v524_v21 = vadd.f32 1.0, %v1396_v15  ;;  %v497_v22 = vmul.f32 0.70710677, %v433_v17  ;;  %v480_v62 = vmul.f32 0.5, %v433_v17 }
 0x141   : > { %v523_v24 = vadd.f32 1.0, %v1398_v19  ;;  %1407 = verf.f32 %v498_v16  ;;  %v1317_v25 = vpack.c.bf16 %v538_v14, %v537_v18  ;;  %v556_v18 = vld [vmem:[%s1846_s2 + $0x18] sm:$0xff] }
 0x142   : > { %v540_v26 = vmul.f32 %v524_v21, %v475_v20  ;;  %1409 = verf.f32 %v497_v22  ;;  %v1212_v27 = vpop.f32.mrb[10].mxu0  ;;  %v557_v22 = vld [vmem:[%s1846_s2 + $0x20] sm:$0xff] }
 0x143   : > { %v1400_v28 = vpop.eup %1399  ;;  %v539_v29 = vmul.f32 %v523_v24, %v474_v23  ;;  %v500_v30 = vmul.f32 0.70710677, %v1212_v27  ;;  %v443_v31 = vpop.f32.mrb[11].mxu0  ;;  %1318 = vmatprep.subr.bf16.mxu1 %v1317_v25  ;;  %v483_v5 = vmul.f32 0.5, %v1212_v27 }
 0x144   : > { %v1402_v32 = vpop.eup %1401  ;;  %v526_v34 = vadd.f32 1.0, %v1400_v28  ;;  %v499_v35 = vmul.f32 0.70710677, %v443_v31  ;;  %1320 = vmatpush3.bf16.msra.mxu1 %v1317_v25  ;;  %v482_v8 = vmul.f32 0.5, %v443_v31 }
 0x145   : > { %v525_v37 = vadd.f32 1.0, %v1402_v32  ;;  %1411 = verf.f32 %v500_v30  ;;  %v1321_v38 = vpack.c.bf16 %v540_v26, %v539_v29  ;;  %v558_v29 = vld [vmem:[%s1846_s2 + $0x28] sm:$0xff] }
 0x146   : > { %v542_v39 = vmul.f32 %v526_v34, %v477_v33  ;;  %1413 = verf.f32 %v499_v35  ;;  %v1215_v40 = vpop.f32.mrb[12].mxu0  ;;  %v1081_v33 = vld [vmem:[%s1846_s2 + $0x30] sm:$0xff] }
 0x147   : > { %v1404_v41 = vpop.eup %1403  ;;  %v541_v42 = vmul.f32 %v525_v37, %v476_v36  ;;  %v502_v43 = vmul.f32 0.70710677, %v1215_v40  ;;  %v453_v44 = vpop.f32.mrb[13].mxu0  ;;  %1322 = vmatprep.subr.bf16.mxu1 %v1321_v38  ;;  %v485_v16 = vmul.f32 0.5, %v1215_v40  ;;  %v1082_v37 = vld [vmem:[%s1846_s2 + $0x38] sm:$0xff]  ;;  %v1085_v40 = vld [vmem:[%s1846_s2 + $0x50] sm:$0xff] }
 0x148   : > { %v1406_v45 = vpop.eup %1405  ;;  %v528_v47 = vadd.f32 1.0, %v1404_v41  ;;  %v501_v48 = vmul.f32 0.70710677, %v453_v44  ;;  %1324 = vmatpush3.bf16.msra.mxu1 %v1321_v38  ;;  %v484_v19 = vmul.f32 0.5, %v453_v44  ;;  %v1083_v38 = vld [vmem:[%s1846_s2 + $0x40] sm:$0xff]  ;;  %v1086_v41 = vld [vmem:[%s1846_s2 + $0x58] sm:$0xff] }
 0x149   : > { %v527_v50 = vadd.f32 1.0, %v1406_v45  ;;  %1415 = verf.f32 %v502_v43  ;;  %v1325_v51 = vpack.c.bf16 %v542_v39, %v541_v42  ;;  %v1084_v39 = vld [vmem:[%s1846_s2 + $0x48] sm:$0xff]  ;;  %v712_v42 = vpop.permute.xlu0 %711 }
 0x14a   : > { %v544_v52 = vmul.f32 %v528_v47, %v479_v46  ;;  %1417 = verf.f32 %v501_v48  ;;  %v1218_v53 = vpop.f32.mrb[14].mxu0 }
 0x14b   : > { %v1408_v54 = vpop.eup %1407  ;;  %v543_v55 = vmul.f32 %v527_v50, %v478_v49  ;;  %v504_v56 = vmul.f32 0.70710677, %v1218_v53  ;;  %v463_v57 = vpop.f32.mrb[15].mxu0  ;;  %1326 = vmatprep.subr.bf16.mxu1 %v1325_v51  ;;  %v487_v27 = vmul.f32 0.5, %v1218_v53 }
 0x14c   : > { %v1410_v58 = vpop.eup %1409  ;;  %v530_v60 = vadd.f32 1.0, %v1408_v54  ;;  %v503_v61 = vmul.f32 0.70710677, %v463_v57  ;;  %1328 = vmatpush3.bf16.msra.mxu1 %v1325_v51  ;;  %v486_v30 = vmul.f32 0.5, %v463_v57 }
 0x14d   : > { %v529_v63 = vadd.f32 1.0, %v1410_v58  ;;  %1419 = verf.f32 %v504_v56  ;;  %v1329_v0 = vpack.c.bf16 %v544_v52, %v543_v55  ;;  %v717_v47 = vpop.permute.xlu0 %716  ;;  %v1794_v58 = vpop.permute.xlu1 %915 }
 0x14e   : > { %v546_v1 = vmul.f32 %v530_v60, %v481_v59  ;;  %1421 = verf.f32 %v503_v61 }
 0x14f   : > { %v1412_v2 = vpop.eup %1411  ;;  %v545_v3 = vmul.f32 %v529_v63, %v480_v62  ;;  %1330 = vmatprep.subr.bf16.mxu1 %v1329_v0 }
 0x150   : > { %v1414_v4 = vpop.eup %1413  ;;  %v532_v6 = vadd.f32 1.0, %v1412_v2  ;;  %1332 = vmatpush3.bf16.msra.mxu1 %v1329_v0 }
 0x151   : > { %v531_v9 = vadd.f32 1.0, %v1414_v4  ;;  %v1333_v10 = vpack.c.bf16 %v546_v1, %v545_v3  ;;  %v722_v53 = vpop.permute.xlu0 %721 }
 0x152   : > { %v548_v12 = vmul.f32 %v532_v6, %v483_v5 }
 0x153   : > { %v1416_v13 = vpop.eup %1415  ;;  %v547_v14 = vmul.f32 %v531_v9, %v482_v8  ;;  %1236 = vmatmul.mubr.msk.f32.vlgmr.msra.gmra.mrb[0].mxu1 %vm559_vm2, %v554_v7  ;;  %1334 = vmatprep.subr.bf16.mxu1 %v1333_v10 }
 0x154   : > { %v1418_v15 = vpop.eup %1417  ;;  %v534_v17 = vadd.f32 1.0, %v1416_v13  ;;  %1336 = vmatpush3.bf16.msra.mxu1 %v1333_v10  ;;  %1238 = vmatprep.mubr.msk.f32.mxu1 %vm559_vm2, %v555_v11 }
 0x155   : > { %v533_v20 = vadd.f32 1.0, %v1418_v15  ;;  %v1337_v21 = vpack.c.bf16 %v548_v12, %v547_v14  ;;  %v727_v62 = vpop.permute.xlu0 %726  ;;  %v921_v14 = vpop.permute.xlu1 %920 }
 0x156   : > { %v550_v23 = vmul.f32 %v534_v17, %v485_v16 }
 0x157   : > { %v1420_v24 = vpop.eup %1419  ;;  %v549_v25 = vmul.f32 %v533_v20, %v484_v19  ;;  %1239 = vmatmul.mubr.msk.f32.gmra.mrb[2].mxu1 %vm559_vm2, %v556_v18  ;;  %1338 = vmatprep.subr.bf16.mxu1 %v1337_v21 }
 0x158   : > { %v1422_v26 = vpop.eup %1421  ;;  %v536_v28 = vadd.f32 1.0, %v1420_v24  ;;  %1340 = vmatpush3.bf16.msra.mxu1 %v1337_v21  ;;  %1241 = vmatprep.mubr.msk.f32.mxu1 %vm559_vm2, %v557_v22 }
 0x159   : > { %v535_v31 = vadd.f32 1.0, %v1422_v26  ;;  %v1341_v32 = vpack.c.bf16 %v550_v23, %v549_v25  ;;  %v732_v17 = vpop.permute.xlu0 %731 }
 0x15a   : > { %v552_v34 = vmul.f32 %v536_v28, %v487_v27 }
 0x15b   : > { %v551_v35 = vmul.f32 %v535_v31, %v486_v30  ;;  %1242 = vmatmul.mubr.msk.f32.gmra.mrb[4].mxu1 %vm559_vm2, %v558_v29  ;;  %1342 = vmatprep.subr.bf16.mxu1 %v1341_v32 }
 0x15c   : > { %1344 = vmatpush3.bf16.msra.mxu1 %v1341_v32  ;;  %1260 = vmatprep.mubr.msk.f32.mxu1 %vm559_vm2, %v1081_v33 }
 0x15d   : > { %v1345_v36 = vpack.c.bf16 %v552_v34, %v551_v35 }
 0x15f   : > { %1346 = vmatprep.subr.bf16.mxu1 %v1345_v36 }
 0x160   : > { %1348 = vmatpush3.bf16.msra.mxu1 %v1345_v36 }
 0x163   : > { %1261 = vmatmul.mubr.msk.f32.vlgmr.msra.gmra.mrb[6].mxu1 %vm559_vm2, %v1082_v37 }
 0x164   : > { %1263 = vmatprep.mubr.msk.f32.mxu1 %vm559_vm2, %v1083_v38  ;;  %v926_v38 = vpop.permute.xlu1 %925 }
 0x167   : > { %1264 = vmatmul.mubr.msk.f32.gmra.mrb[8].mxu1 %vm559_vm2, %v1084_v39  ;;  %v737_v39 = vpop.permute.xlu0 %736 }
 0x168   : > { %1266 = vmatprep.mubr.msk.f32.mxu1 %vm559_vm2, %v1085_v40 }
 0x16b   : > { %1267 = vmatmul.mubr.msk.f32.gmra.mrb[10].mxu1 %vm559_vm2, %v1086_v41 }
 0x226   : > { %v1237_v43 = vpop.f32.mrb[0].mxu1 }
 0x227   : > { %v680_v44 = vmul.f32 0.70710677, %v1237_v43  ;;  %v644_v45 = vpop.f32.mrb[1].mxu1  ;;  %v674_v60 = vmul.f32 0.5, %v1237_v43 }
 0x228   : > { %v679_v46 = vmul.f32 0.70710677, %v644_v45  ;;  %v673_v63 = vmul.f32 0.5, %v644_v45 }
 0x229   : > { %1423 = verf.f32 %v680_v44 }
 0x22a   : > { %1425 = verf.f32 %v679_v46  ;;  %v1240_v48 = vpop.f32.mrb[2].mxu1 }
 0x22b   : > { %v682_v49 = vmul.f32 0.70710677, %v1240_v48  ;;  %v654_v50 = vpop.f32.mrb[3].mxu1  ;;  %v676_v8 = vmul.f32 0.5, %v1240_v48 }
 0x22c   : > { %v681_v51 = vmul.f32 0.70710677, %v654_v50  ;;  %v675_v13 = vmul.f32 0.5, %v654_v50 }
 0x22d   : > { %1427 = verf.f32 %v682_v49 }
 0x22e   : > { %1429 = verf.f32 %v681_v51  ;;  %v1243_v52 = vpop.f32.mrb[4].mxu1 }
 0x22f   : > { %v684_v54 = vmul.f32 0.70710677, %v1243_v52  ;;  %v664_v55 = vpop.f32.mrb[5].mxu1  ;;  %v678_v25 = vmul.f32 0.5, %v1243_v52  ;;  %v931_v52 = vpop.permute.xlu1 %930 }
 0x230   : > { %v683_v56 = vmul.f32 0.70710677, %v664_v55  ;;  %v677_v28 = vmul.f32 0.5, %v664_v55 }
 0x231   : > { %1431 = verf.f32 %v684_v54 }
 0x232   : > { %1433 = verf.f32 %v683_v56 }
 0x233   : > { %v1424_v57 = vpop.eup %1423 }
 0x234   : > { %v1426_v59 = vpop.eup %1425  ;;  %v692_v61 = vadd.f32 1.0, %v1424_v57 }
 0x235   : > { %v691_v0 = vadd.f32 1.0, %v1426_v59 }
 0x236   : > { %v698_v1 = vmul.f32 %v692_v61, %v674_v60  ;;  %v1262_v2 = vpop.f32.mrb[6].mxu1 }
 0x237   : > { %v1428_v3 = vpop.eup %1427  ;;  %v697_v4 = vmul.f32 %v691_v0, %v673_v63  ;;  %v883_v5 = vmul.f32 0.70710677, %v1262_v2  ;;  %v847_v6 = vpop.f32.mrb[7].mxu1 }
 0x238   : > { %v1430_v7 = vpop.eup %1429  ;;  %v740_v9 = vmul.f32 %v717_v47, %v698_v1  ;;  %v694_v10 = vadd.f32 1.0, %v1428_v3  ;;  %v882_v11 = vmul.f32 0.70710677, %v847_v6  ;;  %v877_v47 = vmul.f32 0.5, %v1262_v2 }
 0x239   : > { %v739_v12 = vmul.f32 %v712_v42, %v697_v4  ;;  %v693_v15 = vadd.f32 1.0, %v1430_v7  ;;  %1435 = verf.f32 %v883_v5  ;;  %v876_v49 = vmul.f32 0.5, %v847_v6  ;;  %v936_v5 = vpop.permute.xlu1 %935 }
 0x23a   : > { %v700_v16 = vmul.f32 %v694_v10, %v676_v8  ;;  %1437 = verf.f32 %v882_v11  ;;  %v1265_v18 = vpop.f32.mrb[8].mxu1 }
 0x23b   : > { %v1432_v19 = vpop.eup %1431  ;;  %v745_v20 = vadd.f32 %v740_v9, %v739_v12  ;;  %v699_v21 = vmul.f32 %v693_v15, %v675_v13  ;;  %v885_v22 = vmul.f32 0.70710677, %v1265_v18  ;;  %v857_v23 = vpop.f32.mrb[9].mxu1  ;;  %v879_v61 = vmul.f32 0.5, %v1265_v18 }
 0x23c   : > { %v1434_v24 = vpop.eup %1433  ;;  %v884_v26 = vmul.f32 0.70710677, %v857_v23  ;;  %v696_v27 = vadd.f32 1.0, %v1432_v19  ;;  %v742_v31 = vmul.f32 %v727_v62, %v700_v16  ;;  %v878_v62 = vmul.f32 0.5, %v857_v23 }
 0x23d   : > { %v741_v29 = vmul.f32 %v722_v53, %v699_v21  ;;  %v695_v30 = vadd.f32 1.0, %v1434_v24  ;;  %1439 = verf.f32 %v885_v22  ;;  %v941_v18 = vpop.permute.xlu1 %940 }
 0x23e   : > { %1441 = verf.f32 %v884_v26  ;;  %v1268_v32 = vpop.f32.mrb[10].mxu1  ;;  %v702_v35 = vmul.f32 %v696_v27, %v678_v25 }
 0x23f   : > { %v746_v33 = vadd.f32 %v745_v20, %v741_v29  ;;  %v701_v34 = vmul.f32 %v695_v30, %v677_v28  ;;  %v887_v36 = vmul.f32 0.70710677, %v1268_v32  ;;  %v867_v37 = vpop.f32.mrb[11].mxu1  ;;  %v881_v6 = vmul.f32 0.5, %v1268_v32 }
 0x240   : > { %v886_v40 = vmul.f32 0.70710677, %v867_v37  ;;  %v744_v45 = vmul.f32 %v737_v39, %v702_v35  ;;  %v880_v10 = vmul.f32 0.5, %v867_v37 }
 0x241   : > { %v747_v41 = vadd.f32 %v746_v33, %v742_v31  ;;  %v743_v42 = vmul.f32 %v732_v17, %v701_v34  ;;  %1443 = verf.f32 %v887_v36 }
 0x242   : > { %1445 = verf.f32 %v886_v40 }
 0x243   : > { %v1436_v43 = vpop.eup %1435  ;;  %v748_v44 = vadd.f32 %v747_v41, %v743_v42 }
 0x244   : > { %v1438_v46 = vpop.eup %1437  ;;  %v895_v48 = vadd.f32 1.0, %v1436_v43 }
 0x245   : > { %v894_v50 = vadd.f32 1.0, %v1438_v46  ;;  %v749_v51 = vadd.f32 %v748_v44, %v744_v45 }
 0x246   : > { %v901_v53 = vmul.f32 %v895_v48, %v877_v47 }
 0x247   : > { %v1440_v54 = vpop.eup %1439  ;;  %v900_v55 = vmul.f32 %v894_v50, %v876_v49  ;;  %v750_v9 = vrot.slane %v749_v51, 4 }
 0x248   : > { %v1442_v56 = vpop.eup %1441  ;;  %v944_v57 = vmul.f32 %v921_v14, %v901_v53  ;;  %v897_v59 = vadd.f32 1.0, %v1440_v54 }
 0x249   : > { %v943_v60 = vmul.f32 %v1794_v58, %v900_v55  ;;  %v896_v63 = vadd.f32 1.0, %v1442_v56  ;;  %v751_v15 = vadd.f32 %v750_v9, %v749_v51 }
 0x24a   : > { %v903_v3 = vmul.f32 %v897_v59, %v879_v61 }
 0x24b   : > { %v1444_v0 = vpop.eup %1443  ;;  %v949_v1 = vadd.f32 %v944_v57, %v943_v60  ;;  %v902_v2 = vmul.f32 %v896_v63, %v878_v62  ;;  %v752_v21 = vrot.slane %v751_v15, 2 }
 0x24c   : > { %v1446_v4 = vpop.eup %1445  ;;  %v899_v7 = vadd.f32 1.0, %v1444_v0  ;;  %v946_v12 = vmul.f32 %v931_v52, %v903_v3 }
 0x24d   : > { %v945_v8 = vmul.f32 %v926_v38, %v902_v2  ;;  %v898_v11 = vadd.f32 1.0, %v1446_v4  ;;  %v753_v24 = vadd.f32 %v752_v21, %v751_v15 }
 0x24e   : > { %v905_v14 = vmul.f32 %v899_v7, %v881_v6 }
 0x24f   : > { %v950_v13 = vadd.f32 %v949_v1, %v945_v8  ;;  %v904_v58 = vmul.f32 %v898_v11, %v880_v10  ;;  %v754_v27 = vrot.slane %v753_v24, 1 }
 0x250   : > { %v948_v19 = vmul.f32 %v941_v18, %v905_v14 }
 0x251   : > { %v947_v16 = vmul.f32 %v936_v5, %v904_v58  ;;  %v951_v17 = vadd.f32 %v950_v13, %v946_v12  ;;  %v755_v30 = vadd.f32 %v754_v27, %v753_v24 }
 0x253   : > { %v952_v20 = vadd.f32 %v951_v17, %v947_v16 }
 0x255   : > { %v953_v22 = vadd.f32 %v952_v20, %v948_v19 }
 0x257   : > { %v954_v23 = vrot.slane %v953_v22, 4 }
 0x259   : > { %v955_v25 = vadd.f32 %v954_v23, %v953_v22 }
 0x25b   : > { %v956_v26 = vrot.slane %v955_v25, 2 }
 0x25d   : > { %v957_v28 = vadd.f32 %v956_v26, %v955_v25 }
 0x25f   : > { %v958_v29 = vrot.slane %v957_v28, 1 }
 0x261   : > { %v959_v31 = vadd.f32 %v958_v29, %v957_v28 }
 0x263   : > { %v961_v32 = vsel %vm960_vm3, %v755_v30, %v959_v31 }
 0x264   : > { %962 = vst [vmem:[%s191_s30] sm:$0x3] %v961_v32 }
 0x265   : > { %1460 = shalt.err (!%p1457_p3)
}
 0x266   : > { %s1461_s13 = scalar_lea.hbm %s1802_s8, 32  ;;  %s1465_s22 = scalar_lea.hbm %s1848_s4, 64 }
 0x267   : > { %p1462_p4 = scmp.ne.s32.totalorder %s1802_s8, %s1461_s13  ;;  %p1466_p9 = scmp.lt.u32.totalorder %s1802_s8, %s1848_s4 }
 0x268   : > { %p1467_p10 = scmp.lt.u32.totalorder %s1465_s22, %s1461_s13  ;;  %p1469_p12 = scmp.lt.u32.totalorder %s1461_s13, %s1802_s8 }
 0x269   : > { %p1463_p7 = pnand %p1462_p4, %p1576_p5 }
 0x26a   : > { %p1468_p11 = por %p1467_p10, %p1466_p9 }
 0x26b   : > { %p1464_p8 = pneg %p1463_p7 }
 0x26c   : > { %p1470_p13 = por %p1469_p12, %p1468_p11 }
 0x26e   : > { %p1471_p0 = pnand %p1470_p13, %p1464_p8 }
 0x270   : > { %1474 = shalt.err (!%p1471_p0)
}
 0x271   : > { %1349 = dma.vmem_to_hbm [thread:$0]  (%p1576_p5), %s1804_s5, 32, %s1802_s8, %s964_s9  }
 0x272 PF: > { %p1355_p1 = scmp.ge.s32.totalorder %s1509_s18, 2  ;;  %s989_s28 = sand.u32 1, %s1497_s15  }
 0x273   : > { %s990_s29 = scalar_lea.sflag [#allocation3], %s989_s28 }
 0x274   : > { %p1352_p2 = pnand %p1355_p1, %p1580_p6 }
 0x276   : > { %1492 = dma.done.wait (!%p1352_p2), %s990_s29, 32  }
 0x277   : > { %1494 = vsyncadd (!%p1352_p2), %s990_s29, 4294967264  ;;  %p14_p3 = scmp.ge.s32.totalorder %s1563_s21, 4   ;;  %s1853_s15 = smov %s1501_s16 }
 0x278   : > { %s1854_s16 = smov %s1505_s17  ;;  %s1855_s17 = smov %s1574_s24 }
 0x279   : > { %s1856_s18 = smov %s1563_s21  ;;  %16 = sbr.rel (!%p14_p3) target bundleno = 3 (0x3), region = 73 }
 0x280   :  { %995 = vsyncpa [#allocation3], 1 }
 0x281   :  { %997 = vsyncpa [#allocation3 + $0x1], 1 }

</bundles_post_ra>
